<compile_context>
chip_gen: v5e
topology: v5e:2x2
jax: 0.10.0
libtpu: 0.0.40
codegen_flags: <defaults>
</compile_context>

<pallas_src>
import jax
import jax.numpy as jnp
from jax.experimental import pallas as pl
from jax.experimental.pallas import tpu as pltpu  # noqa: F401  (kept for TPU-specific tuning hooks)

FEAT = 128          # hidden width; also the padded input/output lane width
IN_X = 3            # x feature count
IN_NOISE = 64       # noise feature count


def decider2_kernel(a_ref, w_ref, b_ref, o_ref):
    """a_ref: (B,128) f32   [x | noise | 0-pad]
       w_ref: (4,128,128) bf16  stacked (in,out) weights, W1/W4 zero-padded
       b_ref: (4,128) f32       stacked biases, b4 zero-padded
       o_ref: (B,128) f32       padded output (cols >= servo_num are garbage-free zeros of W4 pad)
    """
    h = a_ref[...]  # f32
    for i in range(4):
        z = jnp.dot(h.astype(jnp.bfloat16), w_ref[i, :, :],
                    preferred_element_type=jnp.float32) + b_ref[i:i + 1, :]
        h = jnp.maximum(z, 0.0) if i < 3 else z
    o_ref[...] = h.astype(o_ref.dtype)


def prepare_params(params, servo_num):
    """One-time packing: pad/stack PyTorch-layout params into 2 lane-dense tensors."""
    w1, b1, w2, b2, w3, b3, w4, b4 = params  # weights (in,out) f32, biases (1,out) f32
    w1p = jnp.zeros((FEAT, FEAT), jnp.float32).at[:IN_X + IN_NOISE, :].set(w1)
    w4p = jnp.zeros((FEAT, FEAT), jnp.float32).at[:, :servo_num].set(w4)
    w_stack = jnp.stack([w1p, w2, w3, w4p]).astype(jnp.bfloat16)        # (4,128,128) bf16
    b4p = jnp.zeros((1, FEAT), jnp.float32).at[:, :servo_num].set(b4)
    b_stack = jnp.concatenate([b1, b2, b3, b4p], axis=0)                # (4,128)   f32
    return w_stack, b_stack


def _full_spec(shape):
    return pl.BlockSpec(shape, lambda: (0,) * len(shape))


def _decider2_padded(a0, w_stack, b_stack):
    B = a0.shape[0]
    return pl.pallas_call(
        decider2_kernel,
        out_shape=jax.ShapeDtypeStruct((B, FEAT), jnp.float32),
        in_specs=[_full_spec(a0.shape),
                  _full_spec(w_stack.shape),
                  _full_spec(b_stack.shape)],
        out_specs=_full_spec((B, FEAT)),
    )(a0, w_stack, b_stack)


@jax.jit
def decider2_forward(x, noise, w_stack, b_stack):
    """x: (B,3) f32, noise: (B,64) f32 -> (B, servo_num) f32 (servo_num from static slice below)."""
    B = x.shape[0]
    # Build the single lane-dense padded activation [x | noise | 0]; fused by jit.
    a0 = jnp.zeros((B, FEAT), jnp.float32)
    a0 = a0.at[:, :IN_X].set(x).at[:, IN_X:IN_X + IN_NOISE].set(noise)
    return _decider2_padded(a0, w_stack, b_stack)


def init_params(servo_num, key):
    """Deterministic synthetic init. Weights stored (in, out); biases (1, out)."""
    dims = [(IN_X + IN_NOISE, FEAT), (FEAT, FEAT), (FEAT, FEAT), (FEAT, servo_num)]
    params = []
    for i, (din, dout) in enumerate(dims):
        kw, kb = jax.random.split(jax.random.fold_in(key, i))
        bound = 1.0 / jnp.sqrt(din)  # PyTorch nn.Linear-style uniform bound
        w = jax.random.uniform(kw, (din, dout), jnp.float32, -bound, bound)
        b = jax.random.uniform(kb, (1, dout), jnp.float32, -bound, bound)
        params += [w, b]
    return tuple(params)


def reference_forward_f32(x, noise, params):
    """Pure-f32 semantic reference (matches the PyTorch module)."""
    w1, b1, w2, b2, w3, b3, w4, b4 = params
    h = jnp.concatenate([x, noise], axis=1)
    h = jnp.maximum(h @ w1 + b1, 0.0)
    h = jnp.maximum(h @ w2 + b2, 0.0)
    h = jnp.maximum(h @ w3 + b3, 0.0)
    return h @ w4 + b4


def reference_forward_bf16_matched(x, noise, w_stack, b_stack, servo_num):
    """Reference with the same bf16-operand / f32-accumulate numerics as the kernel."""
    B = x.shape[0]
    h = jnp.zeros((B, FEAT), jnp.float32)
    h = h.at[:, :IN_X].set(x).at[:, IN_X:IN_X + IN_NOISE].set(noise)
    for i in range(4):
        z = jnp.dot(h.astype(jnp.bfloat16), w_stack[i],
                    preferred_element_type=jnp.float32) + b_stack[i:i + 1, :]
        h = jnp.maximum(z, 0.0) if i < 3 else z
    return h[:, :servo_num]


if __name__ == "__main__":
    key = jax.random.PRNGKey(0)
    k_x, k_n, k_p = jax.random.split(key, 3)

    B = 8
    servo_num = 4

    x = jax.random.normal(k_x, (B, IN_X), jnp.float32)
    noise = jax.random.normal(k_n, (B, IN_NOISE), jnp.float32)
    params = init_params(servo_num, k_p)

    # One-time packing (hoisted out of the per-call path).
    w_stack, b_stack = prepare_params(params, servo_num)
    w_stack = jax.block_until_ready(w_stack)

    out_padded = decider2_forward(x, noise, w_stack, b_stack)
    out_padded = jax.block_until_ready(out_padded)
    out = out_padded[:, :servo_num]

    assert out.shape == (B, servo_num)

    # Exact-numerics check (same bf16 operands, f32 accumulate).
    ref_matched = reference_forward_bf16_matched(x, noise, w_stack, b_stack, servo_num)
    assert jnp.allclose(out, ref_matched, atol=1e-3, rtol=1e-3)

    # Semantic check against the pure-f32 PyTorch-equivalent forward
    # (looser tolerance: weights/activations are quantized to bf16 for the MXU).
    ref_f32 = reference_forward_f32(x, noise, params)
    assert jnp.allclose(out, ref_f32, atol=5e-2, rtol=5e-2)

    print("KERNEL_OK")
</pallas_src>

<mosaic_0001>
module attributes {stable_mosaic.version = 11 : i64} {
  func.func @decider2_kernel(%arg0: memref<8x128xf32, #tpu.memory_space<vmem>>, %arg1: memref<4x128x128xbf16, #tpu.memory_space<vmem>>, %arg2: memref<4x128xf32, #tpu.memory_space<vmem>>, %arg3: memref<8x128xf32, #tpu.memory_space<vmem>>) attributes {dimension_semantics = [], scalar_prefetch = 0 : i64, scratch_operands = 0 : i64, tpu.core_type = #tpu.core_type<tc>} {
    %c0 = arith.constant 0 : index
    %c0_0 = arith.constant 0 : index
    %0 = vector.load %arg0[%c0, %c0_0] : memref<8x128xf32, #tpu.memory_space<vmem>>, vector<8x128xf32>
    %1 = arith.truncf %0 : vector<8x128xf32> to vector<8x128xbf16>
    %c0_1 = arith.constant 0 : index
    %c0_2 = arith.constant 0 : index
    %c0_3 = arith.constant 0 : index
    %2 = vector.load %arg1[%c0_1, %c0_2, %c0_3] : memref<4x128x128xbf16, #tpu.memory_space<vmem>>, vector<1x128x128xbf16>
    %3 = vector.shape_cast %2 : vector<1x128x128xbf16> to vector<128x128xbf16>
    %cst = arith.constant dense<0.000000e+00> : vector<8x128xf32>
    %4 = tpu.matmul %1, %3, %cst {dimension_numbers = #tpu.dot_dimension_numbers<[1], [0], [0], [1], [0, 0, 1, 1], [], []>} : vector<8x128xbf16>, vector<128x128xbf16>, vector<8x128xf32> -> vector<8x128xf32>
    %c0_4 = arith.constant 0 : index
    %c0_5 = arith.constant 0 : index
    %5 = vector.load %arg2[%c0_4, %c0_5] : memref<4x128xf32, #tpu.memory_space<vmem>>, vector<1x128xf32>
    %6 = vector.broadcast %5 : vector<1x128xf32> to vector<8x128xf32>
    %7 = arith.addf %4, %6 : vector<8x128xf32>
    %cst_6 = arith.constant 0.000000e+00 : f32
    %8 = vector.broadcast %cst_6 : f32 to vector<8x128xf32>
    %9 = arith.maximumf %7, %8 : vector<8x128xf32>
    %10 = arith.truncf %9 : vector<8x128xf32> to vector<8x128xbf16>
    %c1 = arith.constant 1 : index
    %c0_7 = arith.constant 0 : index
    %c0_8 = arith.constant 0 : index
    %11 = vector.load %arg1[%c1, %c0_7, %c0_8] : memref<4x128x128xbf16, #tpu.memory_space<vmem>>, vector<1x128x128xbf16>
    %12 = vector.shape_cast %11 : vector<1x128x128xbf16> to vector<128x128xbf16>
    %cst_9 = arith.constant dense<0.000000e+00> : vector<8x128xf32>
    %13 = tpu.matmul %10, %12, %cst_9 {dimension_numbers = #tpu.dot_dimension_numbers<[1], [0], [0], [1], [0, 0, 1, 1], [], []>} : vector<8x128xbf16>, vector<128x128xbf16>, vector<8x128xf32> -> vector<8x128xf32>
    %c1_10 = arith.constant 1 : index
    %c0_11 = arith.constant 0 : index
    %14 = vector.load %arg2[%c1_10, %c0_11] : memref<4x128xf32, #tpu.memory_space<vmem>>, vector<1x128xf32>
    %15 = vector.broadcast %14 : vector<1x128xf32> to vector<8x128xf32>
    %16 = arith.addf %13, %15 : vector<8x128xf32>
    %cst_12 = arith.constant 0.000000e+00 : f32
    %17 = vector.broadcast %cst_12 : f32 to vector<8x128xf32>
    %18 = arith.maximumf %16, %17 : vector<8x128xf32>
    %19 = arith.truncf %18 : vector<8x128xf32> to vector<8x128xbf16>
    %c2 = arith.constant 2 : index
    %c0_13 = arith.constant 0 : index
    %c0_14 = arith.constant 0 : index
    %20 = vector.load %arg1[%c2, %c0_13, %c0_14] : memref<4x128x128xbf16, #tpu.memory_space<vmem>>, vector<1x128x128xbf16>
    %21 = vector.shape_cast %20 : vector<1x128x128xbf16> to vector<128x128xbf16>
    %cst_15 = arith.constant dense<0.000000e+00> : vector<8x128xf32>
    %22 = tpu.matmul %19, %21, %cst_15 {dimension_numbers = #tpu.dot_dimension_numbers<[1], [0], [0], [1], [0, 0, 1, 1], [], []>} : vector<8x128xbf16>, vector<128x128xbf16>, vector<8x128xf32> -> vector<8x128xf32>
    %c2_16 = arith.constant 2 : index
    %c0_17 = arith.constant 0 : index
    %23 = vector.load %arg2[%c2_16, %c0_17] : memref<4x128xf32, #tpu.memory_space<vmem>>, vector<1x128xf32>
    %24 = vector.broadcast %23 : vector<1x128xf32> to vector<8x128xf32>
    %25 = arith.addf %22, %24 : vector<8x128xf32>
    %cst_18 = arith.constant 0.000000e+00 : f32
    %26 = vector.broadcast %cst_18 : f32 to vector<8x128xf32>
    %27 = arith.maximumf %25, %26 : vector<8x128xf32>
    %28 = arith.truncf %27 : vector<8x128xf32> to vector<8x128xbf16>
    %c3 = arith.constant 3 : index
    %c0_19 = arith.constant 0 : index
    %c0_20 = arith.constant 0 : index
    %29 = vector.load %arg1[%c3, %c0_19, %c0_20] : memref<4x128x128xbf16, #tpu.memory_space<vmem>>, vector<1x128x128xbf16>
    %30 = vector.shape_cast %29 : vector<1x128x128xbf16> to vector<128x128xbf16>
    %cst_21 = arith.constant dense<0.000000e+00> : vector<8x128xf32>
    %31 = tpu.matmul %28, %30, %cst_21 {dimension_numbers = #tpu.dot_dimension_numbers<[1], [0], [0], [1], [0, 0, 1, 1], [], []>} : vector<8x128xbf16>, vector<128x128xbf16>, vector<8x128xf32> -> vector<8x128xf32>
    %c3_22 = arith.constant 3 : index
    %c0_23 = arith.constant 0 : index
    %32 = vector.load %arg2[%c3_22, %c0_23] : memref<4x128xf32, #tpu.memory_space<vmem>>, vector<1x128xf32>
    %33 = vector.broadcast %32 : vector<1x128xf32> to vector<8x128xf32>
    %34 = arith.addf %31, %33 : vector<8x128xf32>
    %c0_24 = arith.constant 0 : index
    %c0_25 = arith.constant 0 : index
    %35 = vector.load %arg3[%c0_24, %c0_25] : memref<8x128xf32, #tpu.memory_space<vmem>>, vector<8x128xf32>
    tpu.vector_store %arg3[%c0_24, %c0_25], %34 {strides = array<i32>} : memref<8x128xf32, #tpu.memory_space<vmem>>, vector<8x128xf32>,
    return
  }
}

</mosaic_0001>

<bundles_post_ra>
// kernel: decider2_forward.1
= control target key start
LH: loop header
LB: loop body
LE: loop exit
PB: predicated region body
PF: predicated region fallthrough
CT: control target
= control target key end

     0   :  { %8 = vsyncpa [#allocation3], 0  ;;  %s641_s0 = inlined_call_operand.vmem [shape: f32[8,128], index: 0, kind: input, shape index: {}]   ;;  %s642_s1 = inlined_call_operand.hbm [shape: bf16[4,128,128], index: 1, kind: input, shape index: {}]   ;;  %s643_s2 = inlined_call_operand.vmem [shape: f32[4,128], index: 2, kind: input, shape index: {}]   ;;  %s644_s3 = inlined_call_operand.hbm [shape: f32[8,128], index: 3, kind: output, shape index: {}]  }
   0x1   :  { %9 = vsyncpa [#allocation4], 0  ;;  %s16_s14 = sshll.u32 %s642_s1, 4  ;;  %s596_s15 = smov [#allocation2]   ;;  %s17_s14 = int_to_ptr.hbm [resolvable:$true] %s16_s14 }
   0x2   :  { %s18_s16 = sshll.u32 %s596_s15, 4  ;;  %s597_s17 = smov 64   ;;  %s19_s16 = int_to_ptr.vmem [resolvable:$true] %s18_s16 }
   0x3   :  { %s598_s18 = smov 4  }
   0x4   :  { %24 = dma.hbm_to_vmem [thread:$0]  %s17_s14, 4096, %s19_s16, [#allocation3], %s597_s17, %s597_s17, %s598_s18  }
   0x5   :  { %592 = dma.done.wait [#allocation3], 4096  }
   0x6   :  { %593 = vsyncadd [#allocation3], 4294963200  ;;  %v511_v0 = vld [vmem:[#allocation2 + $0x38] sm:$0xff]  ;;  %v510_v1 = vld [vmem:[#allocation2 + $0x30] sm:$0xff]  ;;  %s599_s27 = smov [#allocation5]   ;;  %s366_s4 = sshll.u32 %s644_s3, 4  ;;  %s367_s4 = int_to_ptr.hbm [resolvable:$true] %s366_s4 }
   0x7   :  { %99 = vmatpush.bf16.msra.mxu0 %v511_v0  ;;  %v519_v2 = vld [vmem:[#allocation2 + $0x78] sm:$0xff]  ;;  %v518_v3 = vld [vmem:[#allocation2 + $0x70] sm:$0xff]  ;;  %v509_v4 = vld [vmem:[#allocation2 + $0x28] sm:$0xff]  ;;  %s364_s28 = sshll.u32 %s599_s27, 4  ;;  %s365_s28 = int_to_ptr.vmem [resolvable:$true] %s364_s28 }
   0x8   :  { %181 = vmatpush.bf16.msra.mxu1 %v519_v2  ;;  %v517_v5 = vld [vmem:[#allocation2 + $0x68] sm:$0xff]  ;;  %v508_v6 = vld [vmem:[#allocation2 + $0x20] sm:$0xff]  ;;  %v507_v8 = vld [vmem:[#allocation2 + $0x18] sm:$0xff] }
   0x9   :  { %v516_v7 = vld [vmem:[#allocation2 + $0x60] sm:$0xff]  ;;  %v515_v9 = vld [vmem:[#allocation2 + $0x58] sm:$0xff]  ;;  %v506_v10 = vld [vmem:[#allocation2 + $0x10] sm:$0xff] }
   0xa   :  { %v514_v11 = vld [vmem:[#allocation2 + $0x50] sm:$0xff]  ;;  %v505_v12 = vld [vmem:[#allocation2 + $0x8] sm:$0xff]  ;;  %v504_v13 = vld [vmem:[#allocation2] sm:$0xff] }
   0xb   :  { %100 = vmatpush.bf16.msra.mxu0 %v510_v1  ;;  %v31_v14 = vld [vmem:[%s641_s0] sm:$0xff]  ;;  %v513_v16 = vld [vmem:[#allocation2 + $0x48] sm:$0xff]  ;;  %v527_v18 = vld [vmem:[#allocation2 + $0xb8] sm:$0xff] }
   0xc   :  { %182 = vmatpush.bf16.msra.mxu1 %v518_v3  ;;  %v32_v15 = vpack.c.bf16 %v31_v14, %v31_v14  ;;  %v512_v17 = vld [vmem:[#allocation2 + $0x40] sm:$0xff]  ;;  %263 = vmatpush.bf16.msra.mxu2 %v527_v18  ;;  %v526_v19 = vld [vmem:[#allocation2 + $0xb0] sm:$0xff]  ;;  %v525_v20 = vld [vmem:[#allocation2 + $0xa8] sm:$0xff] }
   0xd   :  { %v524_v21 = vld [vmem:[#allocation2 + $0xa0] sm:$0xff]  ;;  %v523_v22 = vld [vmem:[#allocation2 + $0x98] sm:$0xff]  ;;  %v522_v23 = vld [vmem:[#allocation2 + $0x90] sm:$0xff] }
   0xe   :  { %v540_v24 = vld [vmem:[%s643_s2] ss:$0 sm:$0xff]  ;;  %v521_v30 = vld [vmem:[#allocation2 + $0x88] sm:$0xff]  ;;  %v535_v32 = vld [vmem:[#allocation2 + $0xf8] sm:$0xff] }
   0xf   :  { %101 = vmatpush.bf16.msra.mxu0 %v509_v4  ;;  %v520_v31 = vld [vmem:[#allocation2 + $0x80] sm:$0xff]  ;;  %345 = vmatpush.bf16.msra.mxu3 %v535_v32  ;;  %v534_v33 = vld [vmem:[#allocation2 + $0xf0] sm:$0xff]  ;;  %v533_v34 = vld [vmem:[#allocation2 + $0xe8] sm:$0xff] }
  0x10   :  { %183 = vmatpush.bf16.msra.mxu1 %v517_v5  ;;  %264 = vmatpush.bf16.msra.mxu2 %v526_v19  ;;  %v532_v35 = vld [vmem:[#allocation2 + $0xe0] sm:$0xff]  ;;  %v531_v36 = vld [vmem:[#allocation2 + $0xd8] sm:$0xff]  ;;  %v530_v37 = vld [vmem:[#allocation2 + $0xd0] sm:$0xff] }
  0x11   :  { %v541_v38 = vld [vmem:[%s643_s2 + $0x1] ss:$0 sm:$0xff]  ;;  %v529_v44 = vld [vmem:[#allocation2 + $0xc8] sm:$0xff]  ;;  %v542_v46 = vld [vmem:[%s643_s2 + $0x2] ss:$0 sm:$0xff] }
  0x12   :  { %v528_v45 = vld [vmem:[#allocation2 + $0xc0] sm:$0xff] }
  0x13   :  { %102 = vmatpush.bf16.msra.mxu0 %v508_v6  ;;  %346 = vmatpush.bf16.msra.mxu3 %v534_v33  ;;  %v543_v52 = vld [vmem:[%s643_s2 + $0x3] ss:$0 sm:$0xff] }
  0x14   :  { %184 = vmatpush.bf16.msra.mxu1 %v516_v7  ;;  %265 = vmatpush.bf16.msra.mxu2 %v525_v20 }
  0x17   :  { %103 = vmatpush.bf16.msra.mxu0 %v507_v8  ;;  %347 = vmatpush.bf16.msra.mxu3 %v533_v34 }
  0x18   :  { %185 = vmatpush.bf16.msra.mxu1 %v515_v9  ;;  %266 = vmatpush.bf16.msra.mxu2 %v524_v21 }
  0x1b   :  { %104 = vmatpush.bf16.msra.mxu0 %v506_v10  ;;  %348 = vmatpush.bf16.msra.mxu3 %v532_v35 }
  0x1c   :  { %186 = vmatpush.bf16.msra.mxu1 %v514_v11  ;;  %267 = vmatpush.bf16.msra.mxu2 %v523_v22 }
  0x1f   :  { %105 = vmatpush.bf16.msra.mxu0 %v505_v12  ;;  %349 = vmatpush.bf16.msra.mxu3 %v531_v36 }
  0x20   :  { %187 = vmatpush.bf16.msra.mxu1 %v513_v16  ;;  %268 = vmatpush.bf16.msra.mxu2 %v522_v23 }
  0x23   :  { %106 = vmatpush.bf16.msra.mxu0 %v504_v13  ;;  %350 = vmatpush.bf16.msra.mxu3 %v530_v37 }
  0x24   :  { %188 = vmatpush.bf16.msra.mxu1 %v512_v17  ;;  %269 = vmatpush.bf16.msra.mxu2 %v521_v30 }
  0x26   :  { %107 = vmatmul.bf16.vlgmr.msra.gmra.mxu0 %v32_v15 }
  0x27   :  { %351 = vmatpush.bf16.msra.mxu3 %v529_v44 }
  0x28   :  { %270 = vmatpush.bf16.msra.mxu2 %v520_v31 }
  0x2b   :  { %352 = vmatpush.bf16.msra.mxu3 %v528_v45 }
  0xa3   :  { %v108_v25 = vpop.f32.mrf.mxu0 }
  0xa4   :  { %v109_v26 = vadd.f32 %v540_v24, %v108_v25 }
  0xa6   :  { %v112_v27 = vmax.f32 %v109_v26, 0.0 }
  0xa8   :  { %v113_v28 = vpack.c.bf16 %v112_v27, %v112_v27 }
  0xaa   :  { %189 = vmatmul.bf16.vlgmr.msra.gmra.mxu1 %v113_v28 }
  0xab   :  { %v110_v29 = vpop.f32.mrf.mxu0 }
 0x127   :  { %v190_v39 = vpop.f32.mrf.mxu1 }
 0x128   :  { %v191_v40 = vadd.f32 %v541_v38, %v190_v39 }
 0x12a   :  { %v194_v41 = vmax.f32 %v191_v40, 0.0 }
 0x12c   :  { %v195_v42 = vpack.c.bf16 %v194_v41, %v194_v41 }
 0x12e   :  { %271 = vmatmul.bf16.vlgmr.msra.gmra.mxu2 %v195_v42 }
 0x12f   :  { %v192_v43 = vpop.f32.mrf.mxu1 }
 0x1b1   :  { %v272_v47 = vpop.f32.mrf.mxu2 }
 0x1b2   :  { %v273_v48 = vadd.f32 %v542_v46, %v272_v47 }
 0x1b4   :  { %v276_v49 = vmax.f32 %v273_v48, 0.0 }
 0x1b6   :  { %v277_v50 = vpack.c.bf16 %v276_v49, %v276_v49 }
 0x1b8   :  { %353 = vmatmul.bf16.vlgmr.msra.gmra.mxu3 %v277_v50 }
 0x1b9   :  { %v274_v51 = vpop.f32.mrf.mxu2 }
 0x23b   :  { %v354_v53 = vpop.f32.mrf.mxu3 }
 0x23c   :  { %v355_v54 = vadd.f32 %v543_v52, %v354_v53 }
 0x23e   :  { %358 = vst [vmem:[#allocation5] sm:$0xff] %v355_v54 }
 0x23f   :  { %369 = dma.vmem_to_hbm [thread:$0]  %s365_s28, 128, %s367_s4, [#allocation4]  }
 0x243   :  { %v356_v55 = vpop.f32.mrf.mxu3 }
 0x244   :  { %594 = dma.done.wait [#allocation4], 128  }
 0x245   :  { %595 = vsyncadd [#allocation4], 4294967168 }
 0x246   :  { %374 = vsyncpa [#allocation3], 1 }
 0x247   :  { %375 = vsyncpa [#allocation4], 1 }

</bundles_post_ra>
